<compile_context>
chip_gen: v7x
topology: tpu7x:2x2x1
jax: 0.10.0
libtpu: 0.0.40
codegen_flags: <defaults>
</compile_context>

<pallas_src>
import jax
import jax.numpy as jnp
from jax.experimental import pallas as pl
from jax.experimental.pallas import tpu as pltpu


# ---------------------------------------------------------------------------
# Kernel body: pure load / add / store (memory-bound elementwise op).
# ---------------------------------------------------------------------------
def _scalar_add_kernel(x_ref, p_ref, o_ref):
    o_ref[...] = x_ref[...].astype(o_ref.dtype) + p_ref[...]


# ---------------------------------------------------------------------------
# Small host-side helpers (all trace-time Python, no device work).
# ---------------------------------------------------------------------------
def _round_up(a: int, m: int) -> int:
    return ((a + m - 1) // m) * m


def _prod(xs) -> int:
    r = 1
    for v in xs:
        r *= int(v)
    return r


def _padded_rows(rows: int, itemsize: int) -> int:
    # Sub-32-bit dtypes pack along sublanes: 8 rows/f32, 16/bf16, 32/int8.
    return _round_up(rows, max(8, 32 // max(1, itemsize)))


def _vmem_capacity_bytes() -> int:
    try:
        cap = getattr(pltpu.get_tpu_info(), "vmem_capacity_bytes", None)
        if cap:
            return int(cap)
    except Exception:
        pass
    return 64 << 20  # conservative (v7x-sized) fallback


def _largest_mult128_divisor(n128: int, cap_elems: int) -> int:
    """Largest multiple-of-128 divisor of n128 (itself a multiple of 128)
    that is <= cap_elems."""
    k_total = n128 // 128
    k_max = max(1, min(k_total, cap_elems // 128))
    for k in range(k_max, 0, -1):
        if k_total % k == 0:
            return k * 128
    return 128


def _pick_feature_block(n128: int, cap_elems: int) -> int:
    """Largest multiple-of-128 divisor of n128 fitting cap_elems, preferring
    one that leaves >= 2 grid steps (pipelining + v7x megacore)."""
    k_total = n128 // 128
    k_max = max(1, min(k_total, cap_elems // 128))
    best = None
    for k in range(k_max, 0, -1):
        if k_total % k == 0:
            if best is None:
                best = k * 128
            if k_total // k >= 2:
                return k * 128
    return best if best is not None else 128


def _pick_row_tile(rows: int, row_bytes: int, itemsize: int, target_bytes: int):
    """Largest divisor of `rows` whose sublane-padded block fits target_bytes,
    preferring one that leaves >= 2 grid steps. Returns None if nothing fits.
    Only sublane-tileable tiles (multiple of 8, or the full extent) are used.
    """
    fits = []
    for t in range(rows, 0, -1):
        if rows % t:
            continue
        if t != rows and t % 8 != 0:
            continue
        if _padded_rows(t, itemsize) * row_bytes <= target_bytes:
            fits.append(t)
    if not fits:
        return None
    for t in fits:            # descending: largest tile first
        if rows // t >= 2:    # prefer >= 2 grid steps
            return t
    return fits[0]


# ---------------------------------------------------------------------------
# Wrapper: ScalarAdder.forward
# ---------------------------------------------------------------------------
def scalar_adder(x: jnp.ndarray, p: jnp.ndarray) -> jnp.ndarray:
    """Pallas equivalent of ScalarAdder.forward: y = x + p.

    `p` broadcasts over x's feature dims (everything after the batch dim),
    PyTorch-style; redundant leading size-1 dims on p are accepted.
    """
    out_dtype = jnp.result_type(x.dtype, p.dtype)

    B = int(x.shape[0])
    feat_shape = tuple(int(d) for d in x.shape[1:])
    N = _prod(feat_shape) if feat_shape else 1

    # PyTorch broadcasting tolerates leading size-1 dims on the parameter
    # (e.g. a (1, C, 1, 1) parameter against a (B, C, H, W) input).
    while p.ndim > len(feat_shape) and p.shape[0] == 1:
        p = jnp.squeeze(p, axis=0)
    p_feat = jnp.broadcast_to(p, feat_shape).astype(out_dtype)

    in_isz = jnp.dtype(x.dtype).itemsize
    out_isz = jnp.dtype(out_dtype).itemsize
    max_isz = max(in_isz, out_isz)

    vmem_cap = _vmem_capacity_bytes()
    # ~8 MiB blocks on 128 MiB-VMEM parts (v5e/v6e), ~4 MiB on 64 MiB (v7x).
    target_bytes = (8 << 20) if vmem_cap >= (128 << 20) else (4 << 20)

    x2 = x.reshape(B, N)
    p2 = p_feat.reshape(1, N)
    pad_cols = 0

    if B == 1 and N % 1024 == 0:
        # ---- Single-example path: fold into dense (M, L) lane-dense rows so
        # no sublanes are wasted; the parameter is tiled identically to x.
        L = _largest_mult128_divisor(N // 8, max(128, min(N // 8, 16384)))
        M = N // L  # guaranteed multiple of 8
        x2 = x2.reshape(M, L)
        p2 = p2.reshape(M, L)
        tr = _pick_row_tile(M, L * max_isz, max_isz, target_bytes) or M
        grid = (M // tr,)
        x_spec = pl.BlockSpec((tr, L), lambda i: (i, 0))
        p_spec = pl.BlockSpec((tr, L), lambda i: (i, 0))
        o_spec = pl.BlockSpec((tr, L), lambda i: (i, 0))
        out2_shape = (M, L)
        blk = ((tr, L), (tr, L), (tr, L))
    else:
        tb = None
        if _padded_rows(1, max_isz) * N * max_isz <= target_bytes:
            tb = _pick_row_tile(B, N * max_isz, max_isz, target_bytes)

        if tb is not None:
            # ---- Preferred path: batch (row) tiling. Fully contiguous
            # (tb, N) HBM slabs for x/out; the (1, N) parameter uses a
            # constant index_map so it stays resident in VMEM.
            grid = (B // tb,)
            x_spec = pl.BlockSpec((tb, N), lambda i: (i, 0))
            p_spec = pl.BlockSpec((1, N), lambda i: (0, 0))
            o_spec = pl.BlockSpec((tb, N), lambda i: (i, 0))
            out2_shape = (B, N)
            blk = ((tb, N), (1, N), (tb, N))
        else:
            # ---- Fallback: a single batch row exceeds the block budget.
            # Tile the feature axis; pad it to a multiple of 128 so stores
            # stay unmasked and the grid stays pipelineable, slice afterwards.
            Npad = _round_up(N, 128)
            pad_cols = Npad - N
            if pad_cols:
                x2 = jnp.pad(x2, ((0, 0), (0, pad_cols)))
                p2 = jnp.pad(p2, ((0, 0), (0, pad_cols)))
            cap_elems = max(
                128, target_bytes // (_padded_rows(B, max_isz) * max_isz))
            bn = _pick_feature_block(Npad, cap_elems)
            grid = (Npad // bn,)
            x_spec = pl.BlockSpec((B, bn), lambda j: (0, j))
            p_spec = pl.BlockSpec((1, bn), lambda j: (0, j))
            o_spec = pl.BlockSpec((B, bn), lambda j: (0, j))
            out2_shape = (B, Npad)
            blk = ((B, bn), (1, bn), (B, bn))

    # Right-size the VMEM request from the actual double-buffered footprint
    # (never request all of v7x's 64 MiB physical VMEM).
    def _blk_bytes(shape, isz):
        r, c = shape
        return _padded_rows(r, isz) * _round_up(c, 128) * isz

    footprint = 2 * (_blk_bytes(blk[0], in_isz)
                     + _blk_bytes(blk[1], out_isz)
                     + _blk_bytes(blk[2], out_isz))
    vmem_limit = int(min(max(footprint + (4 << 20), 16 << 20),
                         (vmem_cap * 3) // 4))

    out2 = pl.pallas_call(
        _scalar_add_kernel,
        out_shape=jax.ShapeDtypeStruct(out2_shape, out_dtype),
        grid_spec=pltpu.PrefetchScalarGridSpec(
            num_scalar_prefetch=0,
            grid=grid,
            in_specs=[x_spec, p_spec],
            out_specs=o_spec,
        ),
        compiler_params=pltpu.CompilerParams(
            dimension_semantics=("parallel",),
            vmem_limit_bytes=vmem_limit,
        ),
        cost_estimate=pl.CostEstimate(
            flops=B * N,
            transcendentals=0,
            bytes_accessed=B * N * in_isz + N * out_isz + B * N * out_isz,
        ),
    )(x2, p2)

    if pad_cols:
        out2 = out2[:, :N]
    return out2.reshape(x.shape)


if __name__ == "__main__":
    key = jax.random.PRNGKey(0)
    kx, kp, kx1, kp1, kxb = jax.random.split(key, 5)

    # Typical ScalarAdder use: (B, C, H, W) input with a (C, H, W) parameter.
    B, C, H, W = 2, 4, 16, 16
    x = jax.random.normal(kx, (B, C, H, W), dtype=jnp.float32)
    # ScalarAdder initializes p to zeros; use random p so the add path is
    # genuinely exercised (forward semantics hold for any p value).
    p = jax.random.normal(kp, (C, H, W), dtype=jnp.float32)

    out = jax.block_until_ready(scalar_adder(x, p))
    ref = x + p
    assert out.shape == ref.shape, (out.shape, ref.shape)
    assert out.dtype == ref.dtype, (out.dtype, ref.dtype)
    assert bool(jnp.array_equal(out, ref)), "mismatch (batch-tiled path)"

    # Default-initialized (zero) parameter must be the identity.
    out0 = jax.block_until_ready(
        scalar_adder(x, jnp.zeros((C, H, W), jnp.float32)))
    assert bool(jnp.array_equal(out0, x)), "zero-parameter path mismatch"

    # Single-example (dense-fold) path + leading size-1 parameter dims.
    x1 = jax.random.normal(kx1, (1, 8, 32, 32), dtype=jnp.float32)
    p1 = jax.random.normal(kp1, (1, 8, 1, 1), dtype=jnp.float32)
    out1 = jax.block_until_ready(scalar_adder(x1, p1))
    assert bool(jnp.array_equal(out1, x1 + p1)), "mismatch (B==1 fold path)"

    # Mixed dtype: bf16 input + f32 parameter promotes to f32 (PyTorch-style).
    xb = jax.random.normal(kxb, (B, C, H, W), dtype=jnp.bfloat16)
    outb = jax.block_until_ready(scalar_adder(xb, p))
    refb = xb.astype(jnp.float32) + p
    assert outb.dtype == jnp.float32, outb.dtype
    assert bool(jnp.array_equal(outb, refb)), "mismatch (dtype-promotion path)"

    print("KERNEL_OK")
</pallas_src>

<mosaic_0001>
module attributes {stable_mosaic.version = 11 : i64} {
  func.func @_scalar_add_kernel(%arg0: i32, %arg1: memref<2x1024xf32, #tpu.memory_space<vmem>>, %arg2: memref<1x1024xf32, #tpu.memory_space<vmem>>, %arg3: memref<2x1024xf32, #tpu.memory_space<vmem>>) attributes {dimension_semantics = [#tpu.dimension_semantics<parallel>], iteration_bounds = array<i64: 1>, scalar_prefetch = 0 : i64, scratch_operands = 0 : i64, tpu.core_type = #tpu.core_type<tc>, window_params = [{transform_indices = @transform_0, window_bounds = array<i64: 2, 1024>}, {pipeline_mode = #tpu.pipeline_mode<synchronous>, transform_indices = @transform_1, window_bounds = array<i64: 1, 1024>}, {transform_indices = @transform_2, window_bounds = array<i64: 2, 1024>}]} {
    %c0 = arith.constant 0 : index
    %c0_0 = arith.constant 0 : index
    %0 = vector.load %arg1[%c0, %c0_0] : memref<2x1024xf32, #tpu.memory_space<vmem>>, vector<2x1024xf32>
    %c0_1 = arith.constant 0 : index
    %c0_2 = arith.constant 0 : index
    %1 = vector.load %arg2[%c0_1, %c0_2] : memref<1x1024xf32, #tpu.memory_space<vmem>>, vector<1x1024xf32>
    %2 = vector.broadcast %1 : vector<1x1024xf32> to vector<2x1024xf32>
    %3 = arith.addf %0, %2 : vector<2x1024xf32>
    %c0_3 = arith.constant 0 : index
    %c0_4 = arith.constant 0 : index
    %4 = vector.load %arg3[%c0_3, %c0_4] : memref<2x1024xf32, #tpu.memory_space<vmem>>, vector<2x1024xf32>
    tpu.vector_store %arg3[%c0_3, %c0_4], %3 {strides = array<i32>} : memref<2x1024xf32, #tpu.memory_space<vmem>>, vector<2x1024xf32>,
    return
  }
  func.func @transform_0(%arg0: i32) -> (i32, i32) {
    %c0_i32 = arith.constant 0 : i32
    %c0_i32_0 = arith.constant 0 : i32
    return %arg0, %c0_i32 : i32, i32
  }
  func.func @transform_1(%arg0: i32) -> (i32, i32) {
    %c0_i32 = arith.constant 0 : i32
    %c0_i32_0 = arith.constant 0 : i32
    %c0_i32_1 = arith.constant 0 : i32
    return %c0_i32, %c0_i32_0 : i32, i32
  }
  func.func @transform_2(%arg0: i32) -> (i32, i32) {
    %c0_i32 = arith.constant 0 : i32
    %c0_i32_0 = arith.constant 0 : i32
    return %arg0, %c0_i32 : i32, i32
  }
}

</mosaic_0001>

<bundles_post_ra>
// kernel: tpu_custom_call.1
= control target key start
LH: loop header
LB: loop body
LE: loop exit
PB: predicated region body
PF: predicated region fallthrough
CT: control target
= control target key end

     0   :  { %7 = vsyncpa [#allocation3], 0  ;;  %s259_s0 = inlined_call_operand.hbm [shape: f32[2,1024], index: 0, kind: input, shape index: {}]   ;;  %s260_s1 = inlined_call_operand.hbm [shape: f32[1,1024], index: 1, kind: input, shape index: {}]   ;;  %s261_s2 = inlined_call_operand.hbm [shape: f32[2,1024], index: 2, kind: output, shape index: {}]  }
   0x1   :  { %8 = vsyncpa [#allocation6], 0 }
   0x2   :  { %9 = vsyncpa [#allocation4], 0  ;;  %s204_s9 = smov [#allocation2]   ;;  %s205_s11 = smov [#allocation5]  }
   0x3   :  { %s16_s10 = sshll.u32 %s204_s9, 4  ;;  %s26_s12 = sshll.u32 %s205_s11, 4  ;;  %s17_s10 = int_to_ptr.vmem [resolvable:$true] %s16_s10  ;;  %s27_s12 = int_to_ptr.vmem [resolvable:$true] %s26_s12 }
   0x4   :  { %s132_s15 = scalar_lea.hbm %s259_s0, 256 }
   0x5   :  { %p133_p0 = scmp.ne.s32.totalorder %s259_s0, %s132_s15  ;;  %p136_p1 = scmp.lt.u32.totalorder %s132_s15, %s259_s0 }
   0x7   :  { %p138_p2 = pnand %p136_p1, %p133_p0 }
   0x9   :  { %141 = shalt.err (!%p138_p2)
}
   0xa   :  { %s142_s20 = scalar_lea.vmem %s17_s10, 256  ;;  %p147_p4 = scmp.lt.s32.totalorder %s17_s10, %s17_s10 }
   0xb   :  { %p143_p3 = scmp.ne.s32.totalorder %s17_s10, %s142_s20  ;;  %p148_p5 = scmp.lt.s32.totalorder %s142_s20, %s142_s20 }
   0xd   :  { %p149_p6 = por %p148_p5, %p147_p4 }
   0xf   :  { %p150_p7 = pnand %p149_p6, %p143_p3 }
  0x11   :  { %153 = shalt.err (!%p150_p7)
}
  0x12   :  { %19 = dma.hbm_to_vmem [thread:$0]  %s259_s0, 256, %s17_s10, [#allocation3]  }
  0x13   :  { %s154_s25 = scalar_lea.hbm %s260_s1, 128 }
  0x14   :  { %p155_p8 = scmp.ne.s32.totalorder %s260_s1, %s154_s25  ;;  %p158_p9 = scmp.lt.u32.totalorder %s154_s25, %s260_s1 }
  0x16   :  { %p160_p10 = pnand %p158_p9, %p155_p8 }
  0x18   :  { %163 = shalt.err (!%p160_p10)
}
  0x19   :  { %s164_s30 = scalar_lea.vmem %s27_s12, 128  ;;  %p169_p12 = scmp.lt.s32.totalorder %s27_s12, %s27_s12 }
  0x1a   :  { %p165_p11 = scmp.ne.s32.totalorder %s27_s12, %s164_s30  ;;  %p170_p13 = scmp.lt.s32.totalorder %s164_s30, %s164_s30 }
  0x1c   :  { %p171_p0 = por %p170_p13, %p169_p12 }
  0x1e   :  { %p172_p1 = pnand %p171_p0, %p165_p11 }
  0x20   :  { %175 = shalt.err (!%p172_p1)
}
  0x21   :  { %29 = dma.hbm_to_vmem [thread:$0]  %s260_s1, 128, %s27_s12, [#allocation6]  }
  0x22   :  { %198 = dma.done.wait [#allocation3], 256  }
  0x23   :  { %199 = vsyncadd [#allocation3], 4294967040 }
  0x24   :  { %200 = dma.done.wait [#allocation6], 128  }
  0x25   :  { %201 = vsyncadd [#allocation6], 4294967168  ;;  %v40_v0 = vlaneseq  ;;  %v206_v1 = vmov 1983009808   ;;  %v38_v13 = vld [vmem:[#allocation5] sm:$0xff]  ;;  %v36_v29 = vld [vmem:[#allocation2] sm:$0xff] }
  0x26   :  { %v75_v2 = vunpack.c.l.s4 %v206_v1  ;;  %v37_v33 = vld [vmem:[#allocation2 + $0x8] sm:$0xff]  ;;  %s207_s1 = smov [#allocation7]  }
  0x27   :  { %v41_v3 = vshrl.u32 %v40_v0, 7  ;;  %s118_s4 = sshll.u32 %s207_s1, 4  ;;  %s119_s4 = int_to_ptr.vmem [resolvable:$true] %s118_s4 }
  0x28   :  { %v76_v4 = vunpack.c.0.s8 %v75_v2  ;;  %s176_s5 = scalar_lea.vmem %s119_s4, 256  ;;  %p181_p3 = scmp.lt.s32.totalorder %s119_s4, %s119_s4 }
  0x29   :  { %v42_v5 = vsub.s32 0, %v41_v3  ;;  %v46_v6 = vsub.s32 1, %v41_v3  ;;  %v50_v7 = vsub.s32 2, %v41_v3  ;;  %v54_v8 = vsub.s32 3, %v41_v3  ;;  %p177_p2 = scmp.ne.s32.totalorder %s119_s4, %s176_s5  ;;  %p182_p4 = scmp.lt.s32.totalorder %s176_s5, %s176_s5 }
  0x2a   :  { %v58_v9 = vsub.s32 4, %v41_v3  ;;  %v62_v10 = vsub.s32 5, %v41_v3  ;;  %v66_v11 = vsub.s32 6, %v41_v3  ;;  %v70_v12 = vsub.s32 7, %v41_v3 }
  0x2b   :  { %v79_v14 = vsub.s32 %v76_v4, %v41_v3  ;;  %v43_v15 = vrot.slane %v38_v13, %v42_v5  ;;  %v47_v16 = vrot.slane %v38_v13, %v46_v6  ;;  %v51_v17 = vrot.slane %v38_v13, %v50_v7  ;;  %p183_p5 = por %p182_p4, %p181_p3 }
  0x2c   :  { %v55_v18 = vrot.slane %v38_v13, %v54_v8  ;;  %v59_v19 = vrot.slane %v38_v13, %v58_v9  ;;  %v63_v20 = vrot.slane %v38_v13, %v62_v10  ;;  %v67_v21 = vrot.slane %v38_v13, %v66_v11 }
  0x2d   :  { %v71_v22 = vrot.slane %v38_v13, %v70_v12  ;;  %v72_v23 = vcombine.low %v43_v15, %v47_v16  ;;  %p184_p6 = pnand %p183_p5, %p177_p2 }
  0x2e   :  { %v73_v24 = vcombine.low %v51_v17, %v55_v18  ;;  %v89_v25 = vcombine.low %v59_v19, %v63_v20 }
  0x2f   :  { %v90_v26 = vcombine.low %v67_v21, %v71_v22  ;;  %v80_v27 = vrot.slane %v72_v23, %v79_v14 }
  0x30   :  { %v87_v28 = vrot.slane %v73_v24, %v79_v14  ;;  %v97_v30 = vrot.slane %v89_v25, %v79_v14 }
  0x31   :  { %v104_v31 = vrot.slane %v90_v26, %v79_v14 }
  0x32   :  { %v88_v32 = vcombine.low %v80_v27, %v87_v28 }
  0x33   :  { %v105_v34 = vcombine.low %v97_v30, %v104_v31 }
  0x34   :  { %v108_v35 = vadd.f32 %v88_v32, %v36_v29 }
  0x35   :  { %v109_v36 = vadd.f32 %v105_v34, %v37_v33 }
  0x36   :  { %110 = vst [vmem:[#allocation7] sm:$0xff] %v108_v35 }
  0x37   :  { %111 = vst [vmem:[#allocation7 + $0x8] sm:$0xff] %v109_v36 }
  0x38   :  { %187 = shalt.err (!%p184_p6)
}
  0x39   :  { %s188_s8 = scalar_lea.hbm %s261_s2, 256 }
  0x3a   :  { %p189_p7 = scmp.ne.s32.totalorder %s261_s2, %s188_s8  ;;  %p192_p8 = scmp.lt.u32.totalorder %s188_s8, %s261_s2 }
  0x3c   :  { %p194_p9 = pnand %p192_p8, %p189_p7 }
  0x3e   :  { %197 = shalt.err (!%p194_p9)
}
  0x3f   :  { %121 = dma.vmem_to_hbm [thread:$0]  %s119_s4, 256, %s261_s2, [#allocation4]  }
  0x40   :  { %202 = dma.done.wait [#allocation4], 256  }
  0x41   :  { %203 = vsyncadd [#allocation4], 4294967040 }
  0x42   :  { %125 = vsyncpa [#allocation3], 1 }
  0x43   :  { %126 = vsyncpa [#allocation6], 1 }
  0x44   :  { %127 = vsyncpa [#allocation4], 1 }

</bundles_post_ra>
